<compile_context>
chip_gen: v5e
topology: v5e:2x2
jax: 0.10.0
libtpu: 0.0.40
codegen_flags: <defaults>
</compile_context>

<pallas_src>
import functools
import math

import jax
import jax.numpy as jnp
from jax.experimental import pallas as pl
from jax.experimental.pallas import tpu as pltpu


# --------------------------------------------------------------------------------------
# Kernel 1: GroupNorm (single-pass stats) + fused QKV projection
# --------------------------------------------------------------------------------------
def _gn_qkv_kernel(x_ref, gamma_ref, beta_ref, gavg_ref, wqkv_ref, bqkv_ref,
                   q_ref, k_ref, v_ref, *, channels, eps):
    x = x_ref[0]                                                  # (N, C) f32

    # Single pass over the slab: per-channel sums over the sublane (N) axis, then reduce
    # per group with a group-averaging matmul (gavg[c, c'] = 1/(N*cg) if same group).
    s = jnp.sum(x, axis=0, keepdims=True)                         # (1, C)
    ss = jnp.sum(x * x, axis=0, keepdims=True)                    # (1, C)
    mean_c = jnp.dot(s, gavg_ref[...], preferred_element_type=jnp.float32)     # (1, C)
    meansq_c = jnp.dot(ss, gavg_ref[...], preferred_element_type=jnp.float32)  # (1, C)
    var_c = meansq_c - mean_c * mean_c
    scale = jax.lax.rsqrt(var_c + eps) * gamma_ref[...]           # (1, C)
    shift = beta_ref[...] - mean_c * scale                        # (1, C)
    hn = (x * scale + shift).astype(jnp.bfloat16)                 # (N, C) bf16 for the MXU

    # One fused (N, C) x (C, 3C) matmul; the softmax scale is already folded into the
    # q third of the weights/bias by the wrapper.
    qkv = jnp.dot(hn, wqkv_ref[...],
                  preferred_element_type=jnp.float32) + bqkv_ref[...]          # (N, 3C) f32
    C = channels
    q_ref[0] = qkv[:, :C].astype(jnp.bfloat16)
    k_ref[0] = qkv[:, C:2 * C].astype(jnp.bfloat16)
    v_ref[0] = qkv[:, 2 * C:].astype(jnp.bfloat16)


# --------------------------------------------------------------------------------------
# Kernel 2: attention over spatial positions, tiled over query tiles
# --------------------------------------------------------------------------------------
def _attn_kernel(q_ref, k_ref, v_ref, x_ref, ctxb_ref, w3_ref, out_ref, *, skip_rescale):
    q = q_ref[0]                                                  # (tq, C) bf16 (pre-scaled)
    k = k_ref[0]                                                  # (N,  C) bf16
    v = v_ref[0]                                                  # (N,  C) bf16

    # scores: contract over the channel axis (== q @ k.T), f32 accumulation.
    s = jax.lax.dot_general(q, k, (((1,), (1,)), ((), ())),
                            preferred_element_type=jnp.float32)   # (tq, N)

    # manual softmax; keep the probabilities unnormalized and defer the 1/l scaling
    # to the (tq, C) output (saves O(tq*N) VALU multiplies).
    m = jnp.max(s, axis=-1, keepdims=True)
    p = jnp.exp(s - m)
    l = jnp.sum(p, axis=-1, keepdims=True)

    h = jnp.dot(p.astype(jnp.bfloat16), v,
                preferred_element_type=jnp.float32)               # (tq, C)
    h = h * pl.reciprocal(l, approx=True)                         # EUP reciprocal

    # NIN_3 left half; the ctx (right) half was folded into ctxb_ref by the wrapper.
    h = jnp.dot(h.astype(jnp.bfloat16), w3_ref[...],
                preferred_element_type=jnp.float32)               # (tq, C)

    res = x_ref[0] + h + ctxb_ref[...]
    if skip_rescale:
        res = res * (1.0 / math.sqrt(2.0))
    out_ref[0] = res


# --------------------------------------------------------------------------------------
# Wrapper
# --------------------------------------------------------------------------------------
def _vmem_limit_bytes():
    try:
        cap = int(pltpu.get_tpu_info().vmem_capacity_bytes)
    except Exception:
        cap = 128 * 1024 * 1024
    # Leave headroom for double-buffered I/O; v7x only has 64 MiB of VMEM per core.
    return min(max(cap * 3 // 4, 32 * 1024 * 1024), 64 * 1024 * 1024)


def _pick_tq(n):
    for t in (512, 256, 128, 64, 32, 16, 8):
        if t <= n and n % t == 0:
            return t
    return n


def image_texts_attention(x, context, params, *, num_groups, skip_rescale=False,
                          eps=1e-6, tq=None):
    """x: (B, N, C) with N = H*W; context: (B, c_channels). Returns (B, N, C) float32."""
    B, N, C = x.shape
    x = x.astype(jnp.float32)

    if tq is None or N % tq != 0:
        tq = _pick_tq(N)
    nq = N // tq

    # ---- parameter folding (done once in the wrapper, outside the kernels) ------------
    inv_sqrt_c = 1.0 / math.sqrt(C)
    # Only the first C output channels of NIN_0 affect the result (the second half pairs
    # with the row-constant ctx term, which cancels in the softmax).
    wq_used = params["wq"][:C, :]
    bq_used = params["bq"][:, :C]
    w_qkv = jnp.concatenate(
        [wq_used.T * inv_sqrt_c, params["wk"].T, params["wv"].T], axis=1
    ).astype(jnp.bfloat16)                                               # (C, 3C) in->out
    b_qkv = jnp.concatenate(
        [bq_used * inv_sqrt_c, params["bk"], params["bv"]], axis=1
    ).astype(jnp.float32)                                                # (1, 3C)

    # group-averaging matrix for single-pass GroupNorm stats
    cg = C // num_groups
    gid = jnp.arange(C) // cg
    gavg = (gid[:, None] == gid[None, :]).astype(jnp.float32) / float(N * cg)   # (C, C)

    # text_proj hoisted out of the kernels; because softmax rows sum to 1 the ctx half of
    # the value tensor passes through as ctx itself, so its NIN_3 contribution is a
    # per-batch rank-1 bias.
    ctx = context.astype(jnp.float32) @ params["wt"].T + params["bt"]            # (B, C)
    ctx_bias = ctx @ params["w3"][:, C:].T + params["b3"]                        # (B, C)
    w3_left = params["w3"][:, :C].T.astype(jnp.bfloat16)                         # (C, C)

    vmem_limit = _vmem_limit_bytes()

    # ---- kernel 1: GroupNorm + fused QKV projection (one grid step per batch) ---------
    gn_kernel = functools.partial(_gn_qkv_kernel, channels=C, eps=eps)
    qkv_shape = jax.ShapeDtypeStruct((B, N, C), jnp.bfloat16)
    q, k, v = pl.pallas_call(
        gn_kernel,
        out_shape=(qkv_shape, qkv_shape, qkv_shape),
        grid_spec=pltpu.PrefetchScalarGridSpec(
            num_scalar_prefetch=0,
            grid=(B,),
            in_specs=[
                pl.BlockSpec((1, N, C), lambda b: (b, 0, 0)),       # x (one batch element)
                pl.BlockSpec((1, C), lambda b: (0, 0)),             # gamma
                pl.BlockSpec((1, C), lambda b: (0, 0)),             # beta
                pl.BlockSpec((C, C), lambda b: (0, 0)),             # group-average matrix
                pl.BlockSpec((C, 3 * C), lambda b: (0, 0)),         # fused QKV weight
                pl.BlockSpec((1, 3 * C), lambda b: (0, 0)),         # fused QKV bias
            ],
            out_specs=(
                pl.BlockSpec((1, N, C), lambda b: (b, 0, 0)),
                pl.BlockSpec((1, N, C), lambda b: (b, 0, 0)),
                pl.BlockSpec((1, N, C), lambda b: (b, 0, 0)),
            ),
        ),
        compiler_params=pltpu.CompilerParams(
            dimension_semantics=("parallel",),
            vmem_limit_bytes=vmem_limit,
        ),
    )(x, params["gamma"], params["beta"], gavg, w_qkv, b_qkv)

    # ---- kernel 2: attention, tiled over query tiles -----------------------------------
    # Per-step working set is q(tq,C) + k/v(N,C) bf16 + a (tq, N) score tile, never the
    # full (N, N) matrix.  k/v keep the same block index across the query-tile axis.
    # TODO(synk): for very long N add a kv-tile axis with online softmax to cap the score
    # tile at (tq, tkv).
    attn_kernel = functools.partial(_attn_kernel, skip_rescale=skip_rescale)
    out = pl.pallas_call(
        attn_kernel,
        out_shape=jax.ShapeDtypeStruct((B, N, C), jnp.float32),
        grid_spec=pltpu.PrefetchScalarGridSpec(
            num_scalar_prefetch=0,
            grid=(B, nq),
            in_specs=[
                pl.BlockSpec((1, tq, C), lambda b, i: (b, i, 0)),   # q tile
                pl.BlockSpec((1, N, C), lambda b, i: (b, 0, 0)),    # k (all keys)
                pl.BlockSpec((1, N, C), lambda b, i: (b, 0, 0)),    # v (all values)
                pl.BlockSpec((1, tq, C), lambda b, i: (b, i, 0)),   # x residual tile
                pl.BlockSpec((1, C), lambda b, i: (b, 0)),          # per-batch ctx bias
                pl.BlockSpec((C, C), lambda b, i: (0, 0)),          # NIN_3 left half
            ],
            out_specs=pl.BlockSpec((1, tq, C), lambda b, i: (b, i, 0)),
        ),
        compiler_params=pltpu.CompilerParams(
            dimension_semantics=("parallel", "parallel"),
            vmem_limit_bytes=vmem_limit,
        ),
    )(q, k, v, x, ctx_bias, w3_left)
    return out


# --------------------------------------------------------------------------------------
# Parameter init (PyTorch-style (out, in) weights) and pure-JAX reference
# --------------------------------------------------------------------------------------
def init_params(key, channels, c_channels):
    C = channels
    keys = jax.random.split(key, 10)

    def u(k, shape, fan_in):
        bound = 1.0 / (fan_in ** 0.5)
        return jax.random.uniform(k, shape, jnp.float32, -bound, bound)

    return dict(
        gamma=jnp.ones((1, C), jnp.float32),
        beta=jnp.zeros((1, C), jnp.float32),
        wq=u(keys[0], (2 * C, C), C), bq=u(keys[1], (1, 2 * C), C),        # NIN_0
        wk=u(keys[2], (C, C), C),     bk=u(keys[3], (1, C), C),            # NIN_1
        wv=u(keys[4], (C, C), C),     bv=u(keys[5], (1, C), C),            # NIN_2
        wt=u(keys[6], (C, c_channels), c_channels),
        bt=u(keys[7], (1, C), c_channels),                                  # text_proj
        w3=u(keys[8], (C, 2 * C), 2 * C), b3=u(keys[9], (1, C), 2 * C),    # NIN_3
    )


def reference(x, context, p, num_groups, eps=1e-6, skip_rescale=False):
    """Pure-JAX reference in the same (B, N, C) layout, mirroring the PyTorch forward."""
    B, N, C = x.shape
    cg = C // num_groups
    xg = x.reshape(B, N, num_groups, cg)
    mu = xg.mean(axis=(1, 3), keepdims=True)
    var = ((xg - mu) ** 2).mean(axis=(1, 3), keepdims=True)
    hn = ((xg - mu) / jnp.sqrt(var + eps)).reshape(B, N, C)
    hn = hn * p["gamma"] + p["beta"]
    q = hn @ p["wq"].T + p["bq"]
    k = hn @ p["wk"].T + p["bk"]
    v = hn @ p["wv"].T + p["bv"]
    ctx = context @ p["wt"].T + p["bt"]
    ctx_b = jnp.broadcast_to(ctx[:, None, :], (B, N, C))
    kf = jnp.concatenate([k, ctx_b], axis=-1)
    vf = jnp.concatenate([v, ctx_b], axis=-1)
    w = jnp.einsum("bnc,bmc->bnm", q, kf) * (C ** -0.5)
    w = jax.nn.softmax(w, axis=-1)
    h = jnp.einsum("bnm,bmc->bnc", w, vf)
    h = h @ p["w3"].T + p["b3"]
    out = x + h
    if skip_rescale:
        out = out / jnp.sqrt(2.0)
    return out


if __name__ == "__main__":
    # Small shapes consistent with the module: n_heads=1, skip_rescale=False.
    B, channels, H, W, c_channels = 2, 8, 8, 8, 32

    num_groups = min(channels // 4, 32)
    while channels % num_groups != 0:
        num_groups -= 1

    key = jax.random.PRNGKey(0)
    kx, kc, kp = jax.random.split(key, 3)

    x_nchw = jax.random.normal(kx, (B, channels, H, W), jnp.float32)   # PyTorch-style NCHW
    context = jax.random.normal(kc, (B, c_channels), jnp.float32)
    params = init_params(kp, channels, c_channels)

    # NCHW -> (B, H*W, C): spatial on the sublane axis, channels on the lane axis.
    x = jnp.transpose(x_nchw, (0, 2, 3, 1)).reshape(B, H * W, channels)

    # tq=32 forces a 2-tile query grid at this toy size so the tiled path is exercised.
    out = image_texts_attention(x, context, params, num_groups=num_groups,
                                skip_rescale=False, tq=32)
    out = jax.block_until_ready(out)

    ref = reference(x, context, params, num_groups)
    err = float(jnp.max(jnp.abs(out - ref)))
    # bf16 MXU operands (vs the all-f32 reference) -> relaxed tolerance.
    assert jnp.allclose(out, ref, rtol=2e-2, atol=2e-2), f"max abs err {err}"

    # (B, N, C) -> NCHW if the caller needs PyTorch layout back
    out_nchw = out.reshape(B, H, W, channels).transpose(0, 3, 1, 2)
    _ = jax.block_until_ready(out_nchw)

    print("KERNEL_OK")
</pallas_src>

<mosaic_0001>
module attributes {stable_mosaic.version = 11 : i64} {
  func.func @_gn_qkv_kernel(%arg0: i32, %arg1: memref<1x64x8xf32, #tpu.memory_space<vmem>>, %arg2: memref<1x8xf32, #tpu.memory_space<vmem>>, %arg3: memref<1x8xf32, #tpu.memory_space<vmem>>, %arg4: memref<8x8xf32, #tpu.memory_space<vmem>>, %arg5: memref<8x24xbf16, #tpu.memory_space<vmem>>, %arg6: memref<1x24xf32, #tpu.memory_space<vmem>>, %arg7: memref<1x64x8xbf16, #tpu.memory_space<vmem>>, %arg8: memref<1x64x8xbf16, #tpu.memory_space<vmem>>, %arg9: memref<1x64x8xbf16, #tpu.memory_space<vmem>>) attributes {dimension_semantics = [#tpu.dimension_semantics<parallel>], iteration_bounds = array<i64: 2>, scalar_prefetch = 0 : i64, scratch_operands = 0 : i64, tpu.core_type = #tpu.core_type<tc>, window_params = [{transform_indices = @transform_0, window_bounds = array<i64: 1, 64, 8>}, {pipeline_mode = #tpu.pipeline_mode<synchronous>, transform_indices = @transform_1, window_bounds = array<i64: 1, 8>}, {pipeline_mode = #tpu.pipeline_mode<synchronous>, transform_indices = @transform_2, window_bounds = array<i64: 1, 8>}, {pipeline_mode = #tpu.pipeline_mode<synchronous>, transform_indices = @transform_3, window_bounds = array<i64: 8, 8>}, {pipeline_mode = #tpu.pipeline_mode<synchronous>, transform_indices = @transform_4, window_bounds = array<i64: 8, 24>}, {pipeline_mode = #tpu.pipeline_mode<synchronous>, transform_indices = @transform_5, window_bounds = array<i64: 1, 24>}, {transform_indices = @transform_6, window_bounds = array<i64: 1, 64, 8>}, {transform_indices = @transform_7, window_bounds = array<i64: 1, 64, 8>}, {transform_indices = @transform_8, window_bounds = array<i64: 1, 64, 8>}]} {
    %c0 = arith.constant 0 : index
    %c0_0 = arith.constant 0 : index
    %c0_1 = arith.constant 0 : index
    %0 = vector.load %arg1[%c0, %c0_0, %c0_1] : memref<1x64x8xf32, #tpu.memory_space<vmem>>, vector<1x64x8xf32>
    %1 = vector.shape_cast %0 : vector<1x64x8xf32> to vector<64x8xf32>
    %cst = arith.constant dense<0.000000e+00> : vector<8xf32>
    %2 = vector.multi_reduction <add>, %1, %cst [0] : vector<64x8xf32> to vector<8xf32>
    %3 = vector.shape_cast %2 : vector<8xf32> to vector<1x8xf32>
    %4 = arith.mulf %1, %1 : vector<64x8xf32>
    %cst_2 = arith.constant dense<0.000000e+00> : vector<8xf32>
    %5 = vector.multi_reduction <add>, %4, %cst_2 [0] : vector<64x8xf32> to vector<8xf32>
    %6 = vector.shape_cast %5 : vector<8xf32> to vector<1x8xf32>
    %c0_3 = arith.constant 0 : index
    %c0_4 = arith.constant 0 : index
    %7 = vector.load %arg4[%c0_3, %c0_4] : memref<8x8xf32, #tpu.memory_space<vmem>>, vector<8x8xf32>
    %cst_5 = arith.constant dense<0.000000e+00> : vector<1x8xf32>
    %8 = tpu.matmul %3, %7, %cst_5 {dimension_numbers = #tpu.dot_dimension_numbers<[1], [0], [0], [1], [0, 0, 1, 1], [], []>} : vector<1x8xf32>, vector<8x8xf32>, vector<1x8xf32> -> vector<1x8xf32>
    %c0_6 = arith.constant 0 : index
    %c0_7 = arith.constant 0 : index
    %9 = vector.load %arg4[%c0_6, %c0_7] : memref<8x8xf32, #tpu.memory_space<vmem>>, vector<8x8xf32>
    %cst_8 = arith.constant dense<0.000000e+00> : vector<1x8xf32>
    %10 = tpu.matmul %6, %9, %cst_8 {dimension_numbers = #tpu.dot_dimension_numbers<[1], [0], [0], [1], [0, 0, 1, 1], [], []>} : vector<1x8xf32>, vector<8x8xf32>, vector<1x8xf32> -> vector<1x8xf32>
    %11 = arith.mulf %8, %8 : vector<1x8xf32>
    %12 = arith.subf %10, %11 : vector<1x8xf32>
    %cst_9 = arith.constant 9.99999997E-7 : f32
    %13 = vector.broadcast %cst_9 : f32 to vector<1x8xf32>
    %14 = arith.addf %12, %13 : vector<1x8xf32>
    %15 = math.rsqrt %14 : vector<1x8xf32>
    %c0_10 = arith.constant 0 : index
    %c0_11 = arith.constant 0 : index
    %16 = vector.load %arg2[%c0_10, %c0_11] : memref<1x8xf32, #tpu.memory_space<vmem>>, vector<1x8xf32>
    %17 = arith.mulf %15, %16 : vector<1x8xf32>
    %c0_12 = arith.constant 0 : index
    %c0_13 = arith.constant 0 : index
    %18 = vector.load %arg3[%c0_12, %c0_13] : memref<1x8xf32, #tpu.memory_space<vmem>>, vector<1x8xf32>
    %19 = arith.mulf %8, %17 : vector<1x8xf32>
    %20 = arith.subf %18, %19 : vector<1x8xf32>
    %21 = vector.broadcast %17 : vector<1x8xf32> to vector<64x8xf32>
    %22 = arith.mulf %1, %21 : vector<64x8xf32>
    %23 = vector.broadcast %20 : vector<1x8xf32> to vector<64x8xf32>
    %24 = arith.addf %22, %23 : vector<64x8xf32>
    %25 = arith.truncf %24 : vector<64x8xf32> to vector<64x8xbf16>
    %c0_14 = arith.constant 0 : index
    %c0_15 = arith.constant 0 : index
    %26 = vector.load %arg5[%c0_14, %c0_15] : memref<8x24xbf16, #tpu.memory_space<vmem>>, vector<8x24xbf16>
    %cst_16 = arith.constant dense<0.000000e+00> : vector<64x24xf32>
    %27 = tpu.matmul %25, %26, %cst_16 {dimension_numbers = #tpu.dot_dimension_numbers<[1], [0], [0], [1], [0, 0, 1, 1], [], []>} : vector<64x8xbf16>, vector<8x24xbf16>, vector<64x24xf32> -> vector<64x24xf32>
    %c0_17 = arith.constant 0 : index
    %c0_18 = arith.constant 0 : index
    %28 = vector.load %arg6[%c0_17, %c0_18] : memref<1x24xf32, #tpu.memory_space<vmem>>, vector<1x24xf32>
    %29 = vector.broadcast %28 : vector<1x24xf32> to vector<64x24xf32>
    %30 = arith.addf %27, %29 : vector<64x24xf32>
    %31 = vector.extract_strided_slice %30 {offsets = [0, 0], sizes = [64, 8], strides = [1, 1]} : vector<64x24xf32> to vector<64x8xf32>
    %32 = arith.truncf %31 : vector<64x8xf32> to vector<64x8xbf16>
    %c0_19 = arith.constant 0 : index
    %c0_20 = arith.constant 0 : index
    %c0_21 = arith.constant 0 : index
    %33 = vector.load %arg7[%c0_19, %c0_20, %c0_21] : memref<1x64x8xbf16, #tpu.memory_space<vmem>>, vector<1x64x8xbf16>
    %34 = vector.shape_cast %33 : vector<1x64x8xbf16> to vector<64x8xbf16>
    %35 = vector.shape_cast %32 : vector<64x8xbf16> to vector<1x64x8xbf16>
    tpu.vector_store %arg7[%c0_19, %c0_20, %c0_21], %35 {strides = array<i32>} : memref<1x64x8xbf16, #tpu.memory_space<vmem>>, vector<1x64x8xbf16>,
    %36 = vector.extract_strided_slice %30 {offsets = [0, 8], sizes = [64, 8], strides = [1, 1]} : vector<64x24xf32> to vector<64x8xf32>
    %37 = arith.truncf %36 : vector<64x8xf32> to vector<64x8xbf16>
    %c0_22 = arith.constant 0 : index
    %c0_23 = arith.constant 0 : index
    %c0_24 = arith.constant 0 : index
    %38 = vector.load %arg8[%c0_22, %c0_23, %c0_24] : memref<1x64x8xbf16, #tpu.memory_space<vmem>>, vector<1x64x8xbf16>
    %39 = vector.shape_cast %38 : vector<1x64x8xbf16> to vector<64x8xbf16>
    %40 = vector.shape_cast %37 : vector<64x8xbf16> to vector<1x64x8xbf16>
    tpu.vector_store %arg8[%c0_22, %c0_23, %c0_24], %40 {strides = array<i32>} : memref<1x64x8xbf16, #tpu.memory_space<vmem>>, vector<1x64x8xbf16>,
    %41 = vector.extract_strided_slice %30 {offsets = [0, 16], sizes = [64, 8], strides = [1, 1]} : vector<64x24xf32> to vector<64x8xf32>
    %42 = arith.truncf %41 : vector<64x8xf32> to vector<64x8xbf16>
    %c0_25 = arith.constant 0 : index
    %c0_26 = arith.constant 0 : index
    %c0_27 = arith.constant 0 : index
    %43 = vector.load %arg9[%c0_25, %c0_26, %c0_27] : memref<1x64x8xbf16, #tpu.memory_space<vmem>>, vector<1x64x8xbf16>
    %44 = vector.shape_cast %43 : vector<1x64x8xbf16> to vector<64x8xbf16>
    %45 = vector.shape_cast %42 : vector<64x8xbf16> to vector<1x64x8xbf16>
    tpu.vector_store %arg9[%c0_25, %c0_26, %c0_27], %45 {strides = array<i32>} : memref<1x64x8xbf16, #tpu.memory_space<vmem>>, vector<1x64x8xbf16>,
    return
  }
  func.func @transform_0(%arg0: i32) -> (i32, i32, i32) {
    %c0_i32 = arith.constant 0 : i32
    %c0_i32_0 = arith.constant 0 : i32
    %c0_i32_1 = arith.constant 0 : i32
    return %arg0, %c0_i32, %c0_i32_0 : i32, i32, i32
  }
  func.func @transform_1(%arg0: i32) -> (i32, i32) {
    %c0_i32 = arith.constant 0 : i32
    %c0_i32_0 = arith.constant 0 : i32
    %c0_i32_1 = arith.constant 0 : i32
    return %c0_i32, %c0_i32_0 : i32, i32
  }
  func.func @transform_2(%arg0: i32) -> (i32, i32) {
    %c0_i32 = arith.constant 0 : i32
    %c0_i32_0 = arith.constant 0 : i32
    %c0_i32_1 = arith.constant 0 : i32
    return %c0_i32, %c0_i32_0 : i32, i32
  }
  func.func @transform_3(%arg0: i32) -> (i32, i32) {
    %c0_i32 = arith.constant 0 : i32
    %c0_i32_0 = arith.constant 0 : i32
    %c0_i32_1 = arith.constant 0 : i32
    return %c0_i32, %c0_i32_0 : i32, i32
  }
  func.func @transform_4(%arg0: i32) -> (i32, i32) {
    %c0_i32 = arith.constant 0 : i32
    %c0_i32_0 = arith.constant 0 : i32
    %c0_i32_1 = arith.constant 0 : i32
    return %c0_i32, %c0_i32_0 : i32, i32
  }
  func.func @transform_5(%arg0: i32) -> (i32, i32) {
    %c0_i32 = arith.constant 0 : i32
    %c0_i32_0 = arith.constant 0 : i32
    %c0_i32_1 = arith.constant 0 : i32
    return %c0_i32, %c0_i32_0 : i32, i32
  }
  func.func @transform_6(%arg0: i32) -> (i32, i32, i32) {
    %c0_i32 = arith.constant 0 : i32
    %c0_i32_0 = arith.constant 0 : i32
    %c0_i32_1 = arith.constant 0 : i32
    return %arg0, %c0_i32, %c0_i32_0 : i32, i32, i32
  }
  func.func @transform_7(%arg0: i32) -> (i32, i32, i32) {
    %c0_i32 = arith.constant 0 : i32
    %c0_i32_0 = arith.constant 0 : i32
    %c0_i32_1 = arith.constant 0 : i32
    return %arg0, %c0_i32, %c0_i32_0 : i32, i32, i32
  }
  func.func @transform_8(%arg0: i32) -> (i32, i32, i32) {
    %c0_i32 = arith.constant 0 : i32
    %c0_i32_0 = arith.constant 0 : i32
    %c0_i32_1 = arith.constant 0 : i32
    return %arg0, %c0_i32, %c0_i32_0 : i32, i32, i32
  }
}

</mosaic_0001>

<bundles_post_ra>
// kernel: tpu_custom_call.1
= control target key start
LH: loop header
LB: loop body
LE: loop exit
PB: predicated region body
PF: predicated region fallthrough
CT: control target
= control target key end

     0   :  { %s836_s27 = smov 0   ;;  %s1013_s0 = inlined_call_operand.vmem [shape: f32[2,64,8], index: 0, kind: input, shape index: {}]   ;;  %s1014_s1 = inlined_call_operand.vmem [shape: f32[1,8], index: 1, kind: input, shape index: {}]   ;;  %s1015_s2 = inlined_call_operand.vmem [shape: f32[1,8], index: 2, kind: input, shape index: {}]   ;;  %s1016_s3 = inlined_call_operand.vmem [shape: f32[8,8], index: 3, kind: input, shape index: {}]   ;;  %s1017_s4 = inlined_call_operand.vmem [shape: bf16[8,24], index: 4, kind: input, shape index: {}]   ;;  %s1018_s5 = inlined_call_operand.vmem [shape: f32[1,24], index: 5, kind: input, shape index: {}]   ;;  %s1019_s6 = inlined_call_operand.vmem [shape: bf16[2,64,8], index: 6, kind: output, shape index: {0}]   ;;  %s1020_s7 = inlined_call_operand.vmem [shape: bf16[2,64,8], index: 7, kind: output, shape index: {1}]   ;;  %s1021_s8 = inlined_call_operand.vmem [shape: bf16[2,64,8], index: 8, kind: output, shape index: {2}]  }
   0x1 LB: > { %s740_s28 = sadd.s32 4294967295, %s787_s27   ;;  %p744_p0 = scmp.ge.s32.totalorder %s787_s27, 1  ;;  %s787_s27 = sphi %s836_s27, %s19_s27  }
   0x2   : > { %p267_p1 = scmp.lt.s32.totalorder %s787_s27, 3 }
   0x4   : > { %p268_p2 = pnand %p744_p0, %p267_p1 }
   0x5   : > { %p311_p3 = scmp.lt.s32.totalorder (!%p268_p2), %s740_s28, 1  ;;  %s789_s25 = smov (!%p268_p2), 120  }
   0x6   : > { %271 = sbr.rel (%p268_p2) target bundleno = 492 (0x1ec), region = 44  ;;  %s790_s26 = smov (!%p268_p2), 112  }
   0xb   : > { %v391_v0 = vld [vmem:[%s1016_s3] sm:$0xff]  ;;  %s1023_s28 = smov (!%p311_p3, %s740_s28), 1  ;;  %vm340_vm0 = vcmask 64512   ;;  %vm497_vm1 = vcmask 1043456   ;;  %vm538_vm5 = vcmask 60416  }
   0xc   : > { %410 = vmatpush.msra.mxu0 %v391_v0  ;;  %433 = vmatpush.msra.mxu1 %v391_v0  ;;  %s761_s9 = sshll.u32 %s1023_s28, 6  ;;  %v480_v61 = vld [vmem:[%s1017_s4] sm:$0xf]  ;;  %s936_s21 = sshll.u32 %s1023_s28, 5 }
   0xd   : > { %s315_s12 = scalar_lea.vmem %s1013_s0, %s761_s9  ;;  %v499_v62 = vsel %vm497_vm1, %v480_v61, 0  ;;  %s942_s24 = scalar_lea.vmem %s1019_s6, %s936_s21 }
   0xe   : > { %v853_v1 = vld [vmem:[%s315_s12] sm:$0xff]  ;;  %v855_v2 = vld [vmem:[%s315_s12 + $0x8] sm:$0xff]  ;;  %v857_v3 = vld [vmem:[%s315_s12 + $0x10] sm:$0xff]  ;;  %508 = vmatpush.bf16.msrb.mxu0 %v499_v62  ;;  %765 = vmatpush.bf16.msrb.mxu1 %v499_v62  ;;  %s980_s30 = scalar_lea.vmem %s1021_s8, %s936_s21  ;;  %s325_s11 = scalar_lea.vmem %s1020_s7, %s936_s21 }
   0xf   : > { %v859_v4 = vld [vmem:[%s315_s12 + $0x18] sm:$0xff]  ;;  %v341_v5 = vsel %vm340_vm0, %v853_v1, 0.0  ;;  %v342_v6 = vsel %vm340_vm0, %v855_v2, 0.0  ;;  %v344_v7 = vsel %vm340_vm0, %v857_v3, 0.0  ;;  %v362_v8 = vmul.f32 %v853_v1, %v853_v1  ;;  %v869_v9 = vld [vmem:[%s315_s12 + $0x20] sm:$0xff]  ;;  %v877_v14 = vld [vmem:[%s315_s12 + $0x28] sm:$0xff]  ;;  %766 = vmatpush.bf16.msra.mxu2 %v499_v62  ;;  %767 = vmatpush.bf16.msra.mxu3 %v499_v62 }
  0x10   : > { %v343_v10 = vadd.f32 %v342_v6, %v341_v5  ;;  %v346_v11 = vsel %vm340_vm0, %v859_v4, 0.0  ;;  %v363_v12 = vmul.f32 %v855_v2, %v855_v2  ;;  %v364_v13 = vmul.f32 %v857_v3, %v857_v3  ;;  %v887_v21 = vld [vmem:[%s315_s12 + $0x30] sm:$0xff]  ;;  %v895_v28 = vld [vmem:[%s315_s12 + $0x38] sm:$0xff] }
  0x11   : > { %v365_v16 = vmul.f32 %v859_v4, %v859_v4  ;;  %v348_v17 = vsel %vm340_vm0, %v869_v9, 0.0  ;;  %v366_v18 = vmul.f32 %v869_v9, %v869_v9  ;;  %v370_v19 = vsel %vm340_vm0, %v362_v8, 0.0 }
  0x12   : > { %v345_v15 = vadd.f32 %v344_v7, %v343_v10  ;;  %v371_v20 = vsel %vm340_vm0, %v363_v12, 0.0  ;;  %v373_v24 = vsel %vm340_vm0, %v364_v13, 0.0  ;;  %v350_v25 = vsel %vm340_vm0, %v877_v14, 0.0  ;;  %v451_v13 = vld [vmem:[%s1014_s1] sm:$0x1] }
  0x13   : > { %v372_v23 = vadd.f32 %v371_v20, %v370_v19  ;;  %v367_v26 = vmul.f32 %v877_v14, %v877_v14  ;;  %v375_v27 = vsel %vm340_vm0, %v365_v16, 0.0  ;;  %v352_v31 = vsel %vm340_vm0, %v887_v21, 0.0 }
  0x14   : > { %v347_v22 = vadd.f32 %v346_v11, %v345_v15  ;;  %v368_v32 = vmul.f32 %v887_v21, %v887_v21  ;;  %v377_v33 = vsel %vm340_vm0, %v366_v18, 0.0  ;;  %v354_v36 = vsel %vm340_vm0, %v895_v28, 0.0 }
  0x15   : > { %v374_v30 = vadd.f32 %v373_v24, %v372_v23  ;;  %v369_v37 = vmul.f32 %v895_v28, %v895_v28  ;;  %v379_v38 = vsel %vm340_vm0, %v367_v26, 0.0 }
  0x16   : > { %v349_v29 = vadd.f32 %v348_v17, %v347_v22  ;;  %v381_v41 = vsel %vm340_vm0, %v368_v32, 0.0  ;;  %v453_v17 = vld [vmem:[%s1015_s2] sm:$0x1] }
  0x17   : > { %v376_v35 = vadd.f32 %v375_v27, %v374_v30  ;;  %v383_v44 = vsel %vm340_vm0, %v369_v37, 0.0 }
  0x18   : > { %v351_v34 = vadd.f32 %v350_v25, %v349_v29 }
  0x19   : > { %v378_v40 = vadd.f32 %v377_v33, %v376_v35 }
  0x1a   : > { %v353_v39 = vadd.f32 %v352_v31, %v351_v34 }
  0x1b   : > { %v380_v43 = vadd.f32 %v379_v38, %v378_v40 }
  0x1c   : > { %v355_v42 = vadd.f32 %v354_v36, %v353_v39 }
  0x1d   : > { %v382_v46 = vadd.f32 %v381_v41, %v380_v43 }
  0x1e   : > { %v356_v45 = vrot.slane %v355_v42, 4 }
  0x1f   : > { %v384_v48 = vadd.f32 %v383_v44, %v382_v46 }
  0x20   : > { %v357_v47 = vadd.f32 %v356_v45, %v355_v42 }
  0x21   : > { %v385_v50 = vrot.slane %v384_v48, 4 }
  0x22   : > { %v358_v49 = vrot.slane %v357_v47, 2 }
  0x23   : > { %v386_v52 = vadd.f32 %v385_v50, %v384_v48 }
  0x24   : > { %v359_v51 = vadd.f32 %v358_v49, %v357_v47 }
  0x25   : > { %v387_v54 = vrot.slane %v386_v52, 2 }
  0x26   : > { %v360_v53 = vrot.slane %v359_v51, 1 }
  0x27   : > { %v388_v56 = vadd.f32 %v387_v54, %v386_v52 }
  0x28   : > { %v361_v55 = vadd.f32 %v360_v53, %v359_v51 }
  0x29   : > { %v389_v57 = vrot.slane %v388_v56, 1 }
  0x2a   : > { %753 = vmatmul.msk.f32.vlgmr.msra.gmra.mxu0 %vm340_vm0, %v361_v55 }
  0x2b   : > { %v390_v58 = vadd.f32 %v389_v57, %v388_v56 }
  0x2d   : > { %754 = vmatmul.msk.f32.vlgmr.msra.gmra.mxu1 %vm340_vm0, %v390_v58 }
  0xa7   : > { %v412_v59 = vpop.f32.mrf.mxu0 }
  0xa8   : > { %v438_v60 = vmul.f32 %v412_v59, %v412_v59 }
  0xaa   : > { %v435_v63 = vpop.f32.mrf.mxu1 }
  0xab   : > { %v439_v0 = vsub.f32 %v435_v63, %v438_v60 }
  0xad   : > { %v440_v5 = vadd.f32 1e-06, %v439_v0 }
  0xaf   : > { %779 = vrsqrt.f32 %v440_v5  ;;  %vm447_vm3 = vweird.f32 %v440_v5 }
  0xb5   : > { %v780_v6 = vpop.eup %779 }
  0xb6   : > { %v442_v7 = vmul.f32 %v780_v6, %v440_v5  ;;  %vm448_vm2 = vweird.f32 %v780_v6 }
  0xb7   : > { %vm449_vm4 = vmor %vm447_vm3, %vm448_vm2 }
  0xb8   : > { %v443_v8 = vmul.f32 %v780_v6, %v442_v7 }
  0xba   : > { %v444_v10 = vmul.f32 0.5, %v443_v8 }
  0xbc   : > { %v445_v11 = vsub.f32 1.5, %v444_v10 }
  0xbe   : > { %v446_v12 = vmul.f32 %v780_v6, %v445_v11 }
  0xc0   : > { %v450_v15 = vsel %vm449_vm4, %v780_v6, %v446_v12 }
  0xc1   : > { %v452_v16 = vmul.f32 %v451_v13, %v450_v15 }
  0xc3   : > { %v454_v18 = vmul.f32 %v452_v16, %v412_v59  ;;  %v456_v19 = vperm.slane %v452_v16, 0 }
  0xc5   : > { %v455_v20 = vsub.f32 %v453_v17, %v454_v18  ;;  %v457_v22 = vmul.f32 %v456_v19, %v853_v1  ;;  %v458_v24 = vmul.f32 %v456_v19, %v855_v2  ;;  %v459_v25 = vmul.f32 %v456_v19, %v857_v3 }
  0xc6   : > { %v460_v26 = vmul.f32 %v456_v19, %v859_v4  ;;  %v461_v27 = vmul.f32 %v456_v19, %v869_v9  ;;  %v462_v29 = vmul.f32 %v456_v19, %v877_v14  ;;  %v463_v30 = vmul.f32 %v456_v19, %v887_v21  ;;  %v778_v9 = vld [vmem:[%s1018_s5] ss:$0 sm:$0xff] }
  0xc7   : > { %v466_v23 = vperm.slane %v455_v20, 0  ;;  %v464_v31 = vmul.f32 %v456_v19, %v895_v28 }
  0xc9   : > { %v468_v32 = vadd.f32 %v466_v23, %v457_v22  ;;  %v469_v33 = vadd.f32 %v466_v23, %v458_v24  ;;  %v470_v34 = vadd.f32 %v466_v23, %v459_v25  ;;  %v471_v1 = vadd.f32 %v466_v23, %v460_v26 }
  0xca   : > { %v472_v35 = vadd.f32 %v466_v23, %v461_v27  ;;  %v473_v36 = vadd.f32 %v466_v23, %v462_v29  ;;  %v474_v2 = vadd.f32 %v466_v23, %v463_v30  ;;  %v475_v37 = vadd.f32 %v466_v23, %v464_v31 }
  0xcb   : > { %v476_v3 = vpack.c.bf16 %v469_v33, %v468_v32  ;;  %v477_v38 = vpack.c.bf16 %v471_v1, %v470_v34 }
  0xcc   : > { %v478_v4 = vpack.c.bf16 %v473_v36, %v472_v35  ;;  %v479_v39 = vpack.c.bf16 %v475_v37, %v474_v2 }
  0xcd   : > { %755 = vmatmul.msk.bf16.vlgmr.msrb.gmra.mxu0 %vm340_vm0, %v476_v3  ;;  %756 = vmatmul.msk.bf16.vlgmr.msrb.gmra.mxu1 %vm340_vm0, %v477_v38 }
  0xce   : > { %757 = vmatmul.msk.bf16.vlgmr.msra.gmra.mxu2 %vm340_vm0, %v478_v4  ;;  %758 = vmatmul.msk.bf16.vlgmr.msra.gmra.mxu3 %vm340_vm0, %v479_v39 }
 0x14a   : > { %v510_v14 = vpop.f32.mrf.mxu0  ;;  %v515_v21 = vpop.f32.mrf.mxu1 }
 0x14b   : > { %v511_v28 = vadd.f32 %v778_v9, %v510_v14  ;;  %v516_v40 = vadd.f32 %v778_v9, %v515_v21 }
 0x14d   : > { %v530_v41 = vpack.c.bf16 %v511_v28, %v511_v28  ;;  %v532_v42 = vpack.c.bf16 %v516_v40, %v516_v40 }
 0x14f   : > { %539 = vst.msk [vmem:[%s942_s24] sm:$0xf] %vm538_vm5, %v530_v41  ;;  %559 = vrot.lane.b32.xlu1 %v532_v42, %s789_s25  ;;  %587 = vrot.lane.b32.xlu2 %v530_v41, %s790_s26 }
 0x150   : > { %541 = vst.msk [vmem:[%s942_s24 + $0x8] sm:$0xf] %vm538_vm5, %v532_v42  ;;  %555 = vrot.lane.b32.xlu0 %v530_v41, %s789_s25 }
 0x151   : > { %v520_v43 = vpop.f32.mrf.mxu2  ;;  %v525_v44 = vpop.f32.mrf.mxu3 }
 0x152   : > { %v521_v45 = vadd.f32 %v778_v9, %v520_v43  ;;  %v526_v46 = vadd.f32 %v778_v9, %v525_v44  ;;  %v512_v47 = vpop.f32.mrf.mxu0  ;;  %v517_v48 = vpop.f32.mrf.mxu1 }
 0x153   : > { %v513_v49 = vadd.f32 %v778_v9, %v512_v47  ;;  %v518_v50 = vadd.f32 %v778_v9, %v517_v48 }
 0x154   : > { %v534_v51 = vpack.c.bf16 %v521_v45, %v521_v45  ;;  %v536_v52 = vpack.c.bf16 %v526_v46, %v526_v46 }
 0x155   : > { %v531_v53 = vpack.c.bf16 %v513_v49, %v513_v49  ;;  %v533_v54 = vpack.c.bf16 %v518_v50, %v518_v50 }
 0x156   : > { %543 = vst.msk [vmem:[%s942_s24 + $0x10] sm:$0xf] %vm538_vm5, %v534_v51 }
 0x157   : > { %545 = vst.msk [vmem:[%s942_s24 + $0x18] sm:$0xf] %vm538_vm5, %v536_v52  ;;  %591 = vrot.lane.b32.xlu1 %v532_v42, %s790_s26  ;;  %563 = vrot.lane.b32.xlu2 %v534_v51, %s789_s25 }
 0x158   : > { %540 = vst.msk [vmem:[%s942_s24 + $0x4] sm:$0xf] %vm538_vm5, %v531_v53  ;;  %567 = vrot.lane.b32.xlu0 %v536_v52, %s789_s25 }
 0x159   : > { %542 = vst.msk [vmem:[%s942_s24 + $0xc] sm:$0xf] %vm538_vm5, %v533_v54  ;;  %v522_v55 = vpop.f32.mrf.mxu2  ;;  %v527_v56 = vpop.f32.mrf.mxu3 }
 0x15a   : > { %v523_v57 = vadd.f32 %v778_v9, %v522_v55  ;;  %v528_v58 = vadd.f32 %v778_v9, %v527_v56 }
 0x15c   : > { %v535_v59 = vpack.c.bf16 %v523_v57, %v523_v57  ;;  %v537_v60 = vpack.c.bf16 %v528_v58, %v528_v58 }
 0x15e   : > { %544 = vst.msk [vmem:[%s942_s24 + $0x14] sm:$0xf] %vm538_vm5, %v535_v59 }
 0x15f   : > { %546 = vst.msk [vmem:[%s942_s24 + $0x1c] sm:$0xf] %vm538_vm5, %v537_v60  ;;  %561 = vrot.lane.b32.xlu1 %v533_v54, %s789_s25  ;;  %593 = vrot.lane.b32.xlu2 %v533_v54, %s790_s26 }
 0x160   : > { %595 = vrot.lane.b32.xlu0 %v534_v51, %s790_s26 }
 0x167   : > { %569 = vrot.lane.b32.xlu1 %v537_v60, %s789_s25  ;;  %565 = vrot.lane.b32.xlu2 %v535_v59, %s789_s25 }
 0x168   : > { %557 = vrot.lane.b32.xlu0 %v531_v53, %s789_s25 }
 0x16f   : > { %597 = vrot.lane.b32.xlu1 %v535_v59, %s790_s26  ;;  %599 = vrot.lane.b32.xlu2 %v536_v52, %s790_s26 }
 0x170   : > { %589 = vrot.lane.b32.xlu0 %v531_v53, %s790_s26 }
 0x178   : > { %601 = vrot.lane.b32.xlu0 %v537_v60, %s790_s26 }
 0x1a9   : > { %v588_v61 = vpop.permute.xlu2 %587 }
 0x1aa   : > { %611 = vst.msk [vmem:[%s980_s30] sm:$0xf] %vm538_vm5, %v588_v61 }
 0x1b1   : > { %v564_v62 = vpop.permute.xlu2 %563 }
 0x1b2   : > { %583 = vst.msk [vmem:[%s325_s11 + $0x10] sm:$0xf] %vm538_vm5, %v564_v62 }
 0x1b9   : > { %v594_v63 = vpop.permute.xlu2 %593 }
 0x1ba   : > { %614 = vst.msk [vmem:[%s980_s30 + $0xc] sm:$0xf] %vm538_vm5, %v594_v63 }
 0x1c1   : > { %v560_v0 = vpop.permute.xlu1 %559  ;;  %v566_v5 = vpop.permute.xlu2 %565 }
 0x1c2   : > { %581 = vst.msk [vmem:[%s325_s11 + $0x8] sm:$0xf] %vm538_vm5, %v560_v0  ;;  %v556_v6 = vpop.permute.xlu0 %555 }
 0x1c3   : > { %584 = vst.msk [vmem:[%s325_s11 + $0x14] sm:$0xf] %vm538_vm5, %v566_v5 }
 0x1c4   : > { %579 = vst.msk [vmem:[%s325_s11] sm:$0xf] %vm538_vm5, %v556_v6 }
 0x1c9   : > { %v592_v7 = vpop.permute.xlu1 %591  ;;  %v600_v8 = vpop.permute.xlu2 %599 }
 0x1ca   : > { %613 = vst.msk [vmem:[%s980_s30 + $0x8] sm:$0xf] %vm538_vm5, %v592_v7  ;;  %v568_v10 = vpop.permute.xlu0 %567 }
 0x1cb   : > { %617 = vst.msk [vmem:[%s980_s30 + $0x18] sm:$0xf] %vm538_vm5, %v600_v8 }
 0x1cc   : > { %585 = vst.msk [vmem:[%s325_s11 + $0x18] sm:$0xf] %vm538_vm5, %v568_v10 }
 0x1d1   : > { %v562_v11 = vpop.permute.xlu1 %561 }
 0x1d2   : > { %582 = vst.msk [vmem:[%s325_s11 + $0xc] sm:$0xf] %vm538_vm5, %v562_v11  ;;  %v596_v12 = vpop.permute.xlu0 %595 }
 0x1d3   : > { %615 = vst.msk [vmem:[%s980_s30 + $0x10] sm:$0xf] %vm538_vm5, %v596_v12 }
 0x1d9   : > { %v570_v13 = vpop.permute.xlu1 %569 }
 0x1da   : > { %586 = vst.msk [vmem:[%s325_s11 + $0x1c] sm:$0xf] %vm538_vm5, %v570_v13  ;;  %v558_v15 = vpop.permute.xlu0 %557 }
 0x1db   : > { %580 = vst.msk [vmem:[%s325_s11 + $0x4] sm:$0xf] %vm538_vm5, %v558_v15 }
 0x1e1   : > { %v598_v16 = vpop.permute.xlu1 %597 }
 0x1e2   : > { %616 = vst.msk [vmem:[%s980_s30 + $0x14] sm:$0xf] %vm538_vm5, %v598_v16  ;;  %v590_v17 = vpop.permute.xlu0 %589 }
 0x1e3   : > { %612 = vst.msk [vmem:[%s980_s30 + $0x4] sm:$0xf] %vm538_vm5, %v590_v17 }
 0x1ea   : > { %v602_v18 = vpop.permute.xlu0 %601 }
 0x1eb   : > { %618 = vst.msk [vmem:[%s980_s30 + $0x1c] sm:$0xf] %vm538_vm5, %v602_v18 }
 0x1ec PF: > { %s19_s27 = sadd.s32 1, %s787_s27  }
 0x1ed   : > { %p16_p4 = scmp.ge.s32.totalorder %s19_s27, 4  }
 0x1ef   :  { %18 = sbr.rel (!%p16_p4) target bundleno = 1 (0x1), region = 98 }

</bundles_post_ra>
